<compile_context>
chip_gen: v6e
topology: v6e:2x2x1
jax: 0.10.0
libtpu: 0.0.40
codegen_flags: <defaults>
</compile_context>

<pallas_src>
import math

import jax
import jax.numpy as jnp
from jax.experimental import pallas as pl
from jax.experimental.pallas import tpu as pltpu

_NEG_BIG = -1e30                       # finite "minus infinity" for padded lanes
_VMEM_TILE_BUDGET = 24 * 1024 * 1024   # tile bytes per step; safe on v5e/v6e/v7x
_VMEM_LIMIT_BYTES = 48 * 1024 * 1024   # explicit scoped-VMEM limit (v7x-safe)


def _round_up(v, m):
    return ((v + m - 1) // m) * m


def _actor_postprocess_kernel(x_ref, w_ref, b_ref, o_ref, acc_ref):
    k = pl.program_id(1)

    @pl.when(k == 0)
    def _():
        acc_ref[...] = jnp.zeros_like(acc_ref)

    # MXU matmul; x is cast to the weight's dtype (bf16) so every generation
    # takes the fast bf16 MXU path. Accumulation stays in f32.
    acc_ref[...] += jnp.dot(
        x_ref[...].astype(w_ref.dtype), w_ref[...],
        preferred_element_type=jnp.float32)

    @pl.when(k == pl.num_programs(1) - 1)
    def _():
        # Padded lanes carry a -1e30 bias -> exp underflows to exactly 0, so
        # the softmax over the real lanes is exact.
        logits = acc_ref[...] + b_ref[...]                 # f32
        m = jnp.max(logits, axis=-1, keepdims=True)
        e = jnp.exp(logits - m)
        denom = jnp.sum(e, axis=-1, keepdims=True)
        # Exact divide: rows sum to 1 to f32 precision (approx reciprocal was
        # the source of the previous normalization failure).
        o_ref[...] = (e / denom).astype(o_ref.dtype)


def prepare_actor_params(weight, bias, matmul_dtype=jnp.bfloat16):
    """One-time parameter preparation (hoisted out of the per-call hot path).

    weight: (F, N) linear weight (transposed vs. torch's (N, F)); bias: (N,).
    Returns (weight_padded  (F, N_pad) in matmul_dtype,
             bias_padded    (1, N_pad) in f32 with -1e30 on padded lanes).
    """
    F, N = weight.shape
    n_pad = pl.cdiv(N, 128) * 128
    w = weight.astype(matmul_dtype)
    b = bias.astype(jnp.float32)
    if n_pad != N:
        w = jnp.pad(w, ((0, 0), (0, n_pad - N)))
        b = jnp.pad(b, (0, n_pad - N), constant_values=_NEG_BIG)
    return w, b.reshape(1, n_pad)


def actor_postprocess(x, weight_p, bias2d, n_out):
    """Flatten -> Linear -> Softmax.

    x: (B, ...) arbitrary trailing dims.
    weight_p / bias2d: prepared params from `prepare_actor_params`.
    n_out: number of real output classes (n_position).
    Returns (B, n_out) softmax probabilities (same dtype as x).
    """
    B = x.shape[0]
    x_flat = x.reshape(B, -1)                       # 'b ... -> b (...)'
    F = x_flat.shape[1]
    n_pad = weight_p.shape[1]
    assert weight_p.shape[0] == F, "feature mismatch"
    assert n_out <= n_pad

    x_bytes = jnp.dtype(x.dtype).itemsize
    w_bytes = jnp.dtype(weight_p.dtype).itemsize
    o_bytes = x_bytes

    # --- K tiling over the flattened feature dim ---------------------------
    # Full-F single step when small; otherwise 512-lane (128-aligned) K tiles
    # so resident W + double-buffered x stays inside v7x's 64 MiB VMEM.
    tk = F if F <= 2048 else 512
    grid_k = pl.cdiv(F, tk)

    # --- batch tiling: size tm from a VMEM byte budget ----------------------
    # Per-step bytes: double-buffered x tile + double-buffered out tile +
    # f32 accumulator scratch, plus the (double-buffered) W tile and bias.
    bytes_per_row = 2 * tk * x_bytes + 2 * n_pad * o_bytes + n_pad * 4
    resident = 2 * tk * n_pad * w_bytes + n_pad * 4
    tm_budget = max(8, (_VMEM_TILE_BUDGET - resident) // bytes_per_row)
    tm = _round_up(min(B, tm_budget), 8)
    tm = min(tm, 2048)                      # keep grid-step granularity sane
    if B >= 32:
        # ensure >= 2 batch steps so ("parallel", ...) spans both v7x TCs
        tm = min(tm, _round_up(pl.cdiv(B, 2), 8))
    tm = max(tm, 8)
    grid_b = pl.cdiv(B, tm)                 # ragged last tile handled by Pallas
    # NOTE: W/bias single-buffering (pipeline_mode=pl.Buffered(1)) skipped:
    # with K-tiling W's block index varies over k, so double-buffering it is
    # the right call; the constant bias block is only n_pad*4 bytes.

    cost = pl.CostEstimate(
        flops=2 * B * F * n_pad + 4 * B * n_pad,
        transcendentals=B * n_pad,          # exp
        bytes_accessed=(x_flat.size * x_bytes
                        + weight_p.size * w_bytes
                        + bias2d.size * 4
                        + B * n_pad * o_bytes),
    )

    out = pl.pallas_call(
        _actor_postprocess_kernel,
        out_shape=jax.ShapeDtypeStruct((B, n_pad), x.dtype),
        grid=(grid_b, grid_k),
        in_specs=[
            pl.BlockSpec((tm, tk), lambda i, k: (i, k)),      # batch/K-tiled x
            pl.BlockSpec((tk, n_pad), lambda i, k: (k, 0)),   # K-tiled weight
            pl.BlockSpec((1, n_pad), lambda i, k: (0, 0)),    # resident bias
        ],
        out_specs=pl.BlockSpec((tm, n_pad), lambda i, k: (i, 0)),
        scratch_shapes=[pltpu.VMEM((tm, n_pad), jnp.float32)],
        compiler_params=pltpu.CompilerParams(
            # batch axis parallel (both TCs on v7x); K axis is a reduction
            dimension_semantics=("parallel", "arbitrary"),
            vmem_limit_bytes=_VMEM_LIMIT_BYTES,
        ),
        cost_estimate=cost,
    )(x_flat, weight_p, bias2d)

    # slice away lane padding (no batch padding was ever materialized)
    return out[:, :n_out]


if __name__ == "__main__":
    key = jax.random.PRNGKey(0)
    k_x, k_w, k_b = jax.random.split(key, 3)

    # Shapes implied by the module: x is any (B, ...) feature map from the
    # actor trunk; n_position = 2*max_units + 1 with max_units=5 -> 11.
    B, C, S = 2, 4, 16          # x: (2, 4, 16) -> flattened F = 64
    F = C * S
    N_POSITION = 2 * 5 + 1      # 11
    dtype = jnp.float32

    x = jax.random.normal(k_x, (B, C, S), dtype=dtype)

    # Deterministic LazyLinear-style init: U(-1/sqrt(F), 1/sqrt(F)).
    bound = 1.0 / math.sqrt(F)
    weight = jax.random.uniform(k_w, (F, N_POSITION), dtype=dtype,
                                minval=-bound, maxval=bound)
    bias = jax.random.uniform(k_b, (N_POSITION,), dtype=dtype,
                              minval=-bound, maxval=bound)

    # One-time parameter prep (lane padding + bf16 cast), outside the hot path.
    weight_p, bias2d = prepare_actor_params(weight, bias)

    probs = actor_postprocess(x, weight_p, bias2d, N_POSITION)
    jax.block_until_ready(probs)

    # Sanity check vs. plain-JAX f32 reference (tolerance accounts for the
    # bf16 MXU matmul path; normalization itself is exact).
    ref = jax.nn.softmax(x.reshape(B, -1) @ weight + bias, axis=-1)
    assert probs.shape == (B, N_POSITION)
    assert jnp.allclose(probs, ref, atol=5e-3, rtol=5e-3)
    assert jnp.allclose(jnp.sum(probs, axis=-1), 1.0, atol=1e-4)

    print("KERNEL_OK")
</pallas_src>

<mosaic_0001>
module attributes {stable_mosaic.version = 11 : i64} {
  func.func @_actor_postprocess_kernel(%arg0: i32, %arg1: i32, %arg2: memref<8x64xf32, #tpu.memory_space<vmem>>, %arg3: memref<64x128xbf16, #tpu.memory_space<vmem>>, %arg4: memref<1x128xf32, #tpu.memory_space<vmem>>, %arg5: memref<8x128xf32, #tpu.memory_space<vmem>>, %arg6: memref<8x128xf32, #tpu.memory_space<vmem>>) attributes {dimension_semantics = [#tpu.dimension_semantics<parallel>, #tpu.dimension_semantics<arbitrary>], iteration_bounds = array<i64: 1, 1>, scalar_prefetch = 0 : i64, scratch_operands = 1 : i64, tpu.core_type = #tpu.core_type<tc>, window_params = [{transform_indices = @transform_0, window_bounds = array<i64: 8, 64>}, {transform_indices = @transform_1, window_bounds = array<i64: 64, 128>}, {pipeline_mode = #tpu.pipeline_mode<synchronous>, transform_indices = @transform_2, window_bounds = array<i64: 1, 128>}, {transform_indices = @transform_3, window_bounds = array<i64: 8, 128>}]} {
    %c0_i32 = arith.constant 0 : i32
    %0 = arith.cmpi eq, %arg1, %c0_i32 : i32
    %1 = arith.extui %0 : i1 to i32
    %c0_i32_0 = arith.constant 0 : i32
    %2 = arith.cmpi ne, %1, %c0_i32_0 : i32
    scf.if %2 {
      %cst_10 = arith.constant 0.000000e+00 : f32
      %13 = vector.broadcast %cst_10 : f32 to vector<8x128xf32>
      %c0_11 = arith.constant 0 : index
      %c0_12 = arith.constant 0 : index
      %14 = vector.load %arg6[%c0_11, %c0_12] : memref<8x128xf32, #tpu.memory_space<vmem>>, vector<8x128xf32>
      tpu.vector_store %arg6[%c0_11, %c0_12], %13 {strides = array<i32>} : memref<8x128xf32, #tpu.memory_space<vmem>>, vector<8x128xf32>,
    } else {
    }
    %c0 = arith.constant 0 : index
    %c0_1 = arith.constant 0 : index
    %3 = vector.load %arg6[%c0, %c0_1] : memref<8x128xf32, #tpu.memory_space<vmem>>, vector<8x128xf32>
    %c0_2 = arith.constant 0 : index
    %c0_3 = arith.constant 0 : index
    %4 = vector.load %arg2[%c0_2, %c0_3] : memref<8x64xf32, #tpu.memory_space<vmem>>, vector<8x64xf32>
    %5 = arith.truncf %4 : vector<8x64xf32> to vector<8x64xbf16>
    %c0_4 = arith.constant 0 : index
    %c0_5 = arith.constant 0 : index
    %6 = vector.load %arg3[%c0_4, %c0_5] : memref<64x128xbf16, #tpu.memory_space<vmem>>, vector<64x128xbf16>
    %cst = arith.constant dense<0.000000e+00> : vector<8x128xf32>
    %7 = tpu.matmul %5, %6, %cst {dimension_numbers = #tpu.dot_dimension_numbers<[1], [0], [0], [1], [0, 0, 1, 1], [], []>} : vector<8x64xbf16>, vector<64x128xbf16>, vector<8x128xf32> -> vector<8x128xf32>
    %8 = arith.addf %3, %7 : vector<8x128xf32>
    %c0_6 = arith.constant 0 : index
    %c0_7 = arith.constant 0 : index
    %9 = vector.load %arg6[%c0_6, %c0_7] : memref<8x128xf32, #tpu.memory_space<vmem>>, vector<8x128xf32>
    tpu.vector_store %arg6[%c0_6, %c0_7], %8 {strides = array<i32>} : memref<8x128xf32, #tpu.memory_space<vmem>>, vector<8x128xf32>,
    %c0_i32_8 = arith.constant 0 : i32
    %10 = arith.cmpi eq, %arg1, %c0_i32_8 : i32
    %11 = arith.extui %10 : i1 to i32
    %c0_i32_9 = arith.constant 0 : i32
    %12 = arith.cmpi ne, %11, %c0_i32_9 : i32
    scf.if %12 {
      %c0_10 = arith.constant 0 : index
      %c0_11 = arith.constant 0 : index
      %13 = vector.load %arg6[%c0_10, %c0_11] : memref<8x128xf32, #tpu.memory_space<vmem>>, vector<8x128xf32>
      %c0_12 = arith.constant 0 : index
      %c0_13 = arith.constant 0 : index
      %14 = vector.load %arg4[%c0_12, %c0_13] : memref<1x128xf32, #tpu.memory_space<vmem>>, vector<1x128xf32>
      %15 = vector.broadcast %14 : vector<1x128xf32> to vector<8x128xf32>
      %16 = arith.addf %13, %15 : vector<8x128xf32>
      %cst_14 = arith.constant dense<0xFF800000> : vector<8xf32>
      %17 = vector.multi_reduction <maximumf>, %16, %cst_14 [1] : vector<8x128xf32> to vector<8xf32>
      %18 = vector.shape_cast %17 : vector<8xf32> to vector<8x1xf32>
      %19 = vector.broadcast %18 : vector<8x1xf32> to vector<8x128xf32>
      %20 = arith.subf %16, %19 : vector<8x128xf32>
      %21 = math.exp %20 : vector<8x128xf32>
      %cst_15 = arith.constant dense<0.000000e+00> : vector<8xf32>
      %22 = vector.multi_reduction <add>, %21, %cst_15 [1] : vector<8x128xf32> to vector<8xf32>
      %23 = vector.shape_cast %22 : vector<8xf32> to vector<8x1xf32>
      %24 = vector.broadcast %23 : vector<8x1xf32> to vector<8x128xf32>
      %25 = arith.divf %21, %24 : vector<8x128xf32>
      %c0_16 = arith.constant 0 : index
      %c0_17 = arith.constant 0 : index
      %26 = vector.load %arg5[%c0_16, %c0_17] : memref<8x128xf32, #tpu.memory_space<vmem>>, vector<8x128xf32>
      tpu.vector_store %arg5[%c0_16, %c0_17], %25 {strides = array<i32>} : memref<8x128xf32, #tpu.memory_space<vmem>>, vector<8x128xf32>,
    } else {
    }
    return
  }
  func.func @transform_0(%arg0: i32, %arg1: i32) -> (i32, i32) {
    %c0_i32 = arith.constant 0 : i32
    return %arg0, %arg1 : i32, i32
  }
  func.func @transform_1(%arg0: i32, %arg1: i32) -> (i32, i32) {
    %c0_i32 = arith.constant 0 : i32
    %c0_i32_0 = arith.constant 0 : i32
    return %arg1, %c0_i32 : i32, i32
  }
  func.func @transform_2(%arg0: i32, %arg1: i32) -> (i32, i32) {
    %c0_i32 = arith.constant 0 : i32
    %c0_i32_0 = arith.constant 0 : i32
    %c0_i32_1 = arith.constant 0 : i32
    return %c0_i32, %c0_i32_0 : i32, i32
  }
  func.func @transform_3(%arg0: i32, %arg1: i32) -> (i32, i32) {
    %c0_i32 = arith.constant 0 : i32
    %c0_i32_0 = arith.constant 0 : i32
    return %arg0, %c0_i32 : i32, i32
  }
}

</mosaic_0001>

<bundles_post_ra>
// kernel: tpu_custom_call.1
= control target key start
LH: loop header
LB: loop body
LE: loop exit
PB: predicated region body
PF: predicated region fallthrough
CT: control target
= control target key end

     0   :  { %8 = vsyncpa [#allocation4], 0  ;;  %s323_s0 = inlined_call_operand.hbm [shape: f32[2,64], index: 0, kind: input, shape index: {}]   ;;  %s324_s1 = inlined_call_operand.hbm [shape: bf16[64,128], index: 1, kind: input, shape index: {}]   ;;  %s325_s2 = inlined_call_operand.vmem [shape: f32[1,128], index: 2, kind: input, shape index: {}]   ;;  %s326_s3 = inlined_call_operand.hbm [shape: f32[2,128], index: 3, kind: output, shape index: {}]  }
   0x1   :  { %9 = vsyncpa [#allocation7], 0 }
   0x2   :  { %10 = vsyncpa [#allocation5], 0 }
   0x3   :  { %15 = vsyncadd [#allocation4], 96  ;;  %s276_s12 = smov [#allocation3]  }
   0x4   :  { %s16_s13 = sshll.u32 %s276_s12, 4  ;;  %s17_s13 = int_to_ptr.vmem [resolvable:$true] %s16_s13 }
   0x5   :  { %s218_s14 = scalar_lea.vmem %s17_s13, 32  ;;  %s222_s15 = scalar_lea.vmem %s17_s13, 128 }
   0x6   :  { %p219_p0 = scmp.ne.s32.totalorder %s17_s13, %s218_s14  ;;  %p223_p1 = scmp.lt.s32.totalorder %s17_s13, %s17_s13 }
   0x7   :  { %p224_p2 = scmp.lt.s32.totalorder %s222_s15, %s218_s14 }
   0x9   :  { %p225_p3 = por %p224_p2, %p223_p1 }
   0xb   :  { %p226_p4 = pnand %p225_p3, %p219_p0 }
   0xd   :  { %229 = shalt.err (!%p226_p4)
}
   0xe   :  { %s277_s16 = smov 32   ;;  %s278_s17 = smov 2  }
   0xf   :  { %22 = dma.hbm_to_vmem [thread:$0]  %s323_s0, 32, %s17_s13, [#allocation4], %s277_s16, %s277_s16, %s278_s17  }
  0x10   :  { %s279_s20 = smov [#allocation6]  }
  0x11   :  { %s28_s21 = sshll.u32 %s279_s20, 4  ;;  %s29_s21 = int_to_ptr.vmem [resolvable:$true] %s28_s21 }
  0x12   :  { %s238_s22 = scalar_lea.vmem %s29_s21, 512  ;;  %p243_p6 = scmp.lt.s32.totalorder %s29_s21, %s29_s21 }
  0x13   :  { %p239_p5 = scmp.ne.s32.totalorder %s29_s21, %s238_s22  ;;  %p244_p7 = scmp.lt.s32.totalorder %s238_s22, %s238_s22 }
  0x15   :  { %p245_p8 = por %p244_p7, %p243_p6 }
  0x17   :  { %p246_p9 = pnand %p245_p8, %p239_p5 }
  0x19   :  { %249 = shalt.err (!%p246_p9)
}
  0x1a   :  { %s280_s23 = smov 64   ;;  %s281_s24 = smov 4  }
  0x1b   :  { %34 = dma.hbm_to_vmem [thread:$0]  %s324_s1, 512, %s29_s21, [#allocation7], %s280_s23, %s280_s23, %s281_s24  }
  0x1c   :  { %270 = dma.done.wait [#allocation4], 128  }
  0x1d   :  { %271 = vsyncadd [#allocation4], 4294967168 }
  0x1e   :  { %272 = dma.done.wait [#allocation7], 512  }
  0x1f   :  { %273 = vsyncadd [#allocation7], 4294966784  ;;  %v282_v0 = vmov 0.0   ;;  %vm283_vm0 = vmmov 0   ;;  %v202_v1 = vld [vmem:[#allocation6 + $0x18] sm:$0xff]   ;;  %v203_v2 = vld [vmem:[#allocation6 + $0x10] sm:$0xff]  }
  0x20   :  { %181 = vmatprep.subr.bf16.mxu0 %v282_v0  ;;  %189 = vmatprep.mubr.msk.bf16.mxu0 %vm283_vm0, %v282_v0  ;;  %v204_v3 = vld [vmem:[#allocation6 + $0x8] sm:$0xff]   ;;  %v205_v4 = vld [vmem:[#allocation6] sm:$0xff]   ;;  %v50_v5 = vld [vmem:[#allocation3] sm:$0xff]  ;;  %vm84_vm1 = vcmask 523264  }
  0x21   :  { %182 = vmatpush3.bf16.msra.mxu0 %v202_v1  ;;  %v51_v6 = vpack.c.bf16 %v50_v5, %v50_v5  ;;  %v175_v7 = vld [vmem:[%s325_s2] ss:$0 sm:$0xff] }
  0x22   :  { %183 = vmatprep.subr.bf16.mxu0 %v282_v0 }
  0x25   :  { %184 = vmatpush3.bf16.msra.mxu0 %v203_v2 }
  0x26   :  { %185 = vmatprep.subr.bf16.mxu0 %v282_v0 }
  0x29   :  { %186 = vmatpush3.bf16.msra.mxu0 %v204_v3 }
  0x2a   :  { %187 = vmatprep.subr.bf16.mxu0 %v282_v0 }
  0x2d   :  { %188 = vmatpush3.bf16.msra.mxu0 %v205_v4 }
  0x30   :  { %190 = vmatmul.mubr.msk.bf16.vlgmr.msra.gmra.mxu0 %vm84_vm1, %v51_v6 }
  0xf0   :  { %v122_v8 = vpop.f32.mrf.mxu0 }
  0xf1   :  { %v141_v9 = vadd.f32 %v175_v7, %v122_v8 }
  0xf2   :  { %v191_v10 = vpop.f32.mrf.mxu0 }
  0xf3   :  { %142 = vmax.xlane.f32.xlu0 %v141_v9 }
  0xf4   :  { %v125_v11 = vpop.f32.mrf.mxu0 }
  0xf6   :  { %v192_v12 = vpop.f32.mrf.mxu0 }
 0x17c   :  { %v143_v13 = vpop.xlane.xlu0 %142 }
 0x17d   :  { %v144_v14 = vsub.f32 %v141_v9, %v143_v13 }
 0x17f   :  { %v145_v15 = vmul.f32 1.442695, %v144_v14 }
 0x181   :  { %206 = vpow2.f32 %v145_v15 }
 0x18e   :  { %v207_v16 = vpop.eup %206 }
 0x18f   :  { %147 = vadd.xlane.f32.xlu0 %v207_v16 }
 0x218   :  { %v148_v17 = vpop.xlane.xlu0 %147 }
 0x219   :  { %208 = vrcp.f32 %v148_v17 }
 0x226   :  { %v209_v18 = vpop.eup %208 }
 0x227   :  { %v150_v19 = vmul.f32 %v209_v18, %v207_v16 }
 0x229   :  { %151 = vst [vmem:[#allocation8] sm:$0xff] %v150_v19 }
 0x22a   :  { %156 = vsyncadd [#allocation5], 96  ;;  %s284_s27 = smov [#allocation8]  }
 0x22b   :  { %s157_s2 = sshll.u32 %s284_s27, 4  ;;  %s158_s2 = int_to_ptr.vmem [resolvable:$true] %s157_s2 }
 0x22c   :  { %s250_s28 = scalar_lea.vmem %s158_s2, 32  ;;  %s254_s29 = scalar_lea.vmem %s158_s2, 128 }
 0x22d   :  { %p251_p10 = scmp.ne.s32.totalorder %s158_s2, %s250_s28  ;;  %p255_p11 = scmp.lt.s32.totalorder %s158_s2, %s158_s2 }
 0x22e   :  { %p256_p12 = scmp.lt.s32.totalorder %s254_s29, %s250_s28 }
 0x230   :  { %p257_p13 = por %p256_p12, %p255_p11 }
 0x232   :  { %p258_p0 = pnand %p257_p13, %p251_p10 }
 0x234   :  { %261 = shalt.err (!%p258_p0)
}
 0x235   :  { %163 = dma.vmem_to_hbm [thread:$0]  %s158_s2, 32, %s326_s3, [#allocation5], %s277_s16, %s277_s16, %s278_s17  }
 0x236   :  { %274 = dma.done.wait [#allocation5], 128  }
 0x237   :  { %275 = vsyncadd [#allocation5], 4294967168 }
 0x238   :  { %167 = vsyncpa [#allocation4], 1 }
 0x239   :  { %168 = vsyncpa [#allocation7], 1 }
 0x23a   :  { %169 = vsyncpa [#allocation5], 1 }

</bundles_post_ra>
